<compile_context>
chip_gen: v7x
topology: tpu7x:2x2x1
jax: 0.10.0
libtpu: 0.0.40
codegen_flags: <defaults>
</compile_context>

<pallas_src>
import functools

import jax
import jax.numpy as jnp
from jax import lax
from jax.experimental import pallas as pl
from jax.experimental.pallas import tpu as pltpu


def _prep_kernel(z1_ref, z2_ref, rep_ref, pos_ref, *, inv_sqrt_temp, inv_temp):
    z1 = z1_ref[...].astype(jnp.float32)
    z2 = z2_ref[...].astype(jnp.float32)

    # torch.nn.functional.normalize(dim=1): x / max(||x||, eps), eps = 1e-12.
    # rsqrt(max(sumsq, eps^2)) == 1 / max(||x||, eps); rsqrt rides the EUP.
    eps2 = jnp.float32(1e-24)
    r1 = lax.rsqrt(jnp.maximum(jnp.sum(z1 * z1, axis=1, keepdims=True), eps2))
    r2 = lax.rsqrt(jnp.maximum(jnp.sum(z2 * z2, axis=1, keepdims=True), eps2))
    z1n = z1 * r1
    z2n = z2 * r2

    # labels[i] = (i + N) mod 2N  =>  positive logit of row i and row N+i is
    # dot(z1n_i, z2n_i) / T.  Keep it in f32.
    pos = jnp.sum(z1n * z2n, axis=1, keepdims=True) * jnp.float32(inv_temp)
    pos_ref[0] = pos
    pos_ref[1] = pos

    # Fold 1/sqrt(T) into both halves so (rep @ rep.T) logits carry exactly 1/T.
    scale = jnp.float32(inv_sqrt_temp)
    rep_ref[0] = (z1n * scale).astype(rep_ref.dtype)
    rep_ref[1] = (z2n * scale).astype(rep_ref.dtype)


def _flash_kernel(rep_row_ref, rep_col_ref, lse_ref, l_scr, *,
                  inv_temp, tn, mask_val):
    i = pl.program_id(0)
    tm = rep_row_ref.shape[0]
    two_n = rep_col_ref.shape[0]
    num_col_tiles = two_n // tn
    row0 = i * tm

    l_scr[...] = jnp.zeros((tm, 1), jnp.float32)

    @pl.loop(0, num_col_tiles)
    def _(c):
        col0 = pl.multiple_of(c * tn, tn)
        cols = rep_col_ref[pl.ds(col0, tn), :]
        # (tm, D) . (tn, D) contracting on D -> (tm, tn); bf16 ops, f32 acc.
        s = lax.dot_general(
            rep_row_ref[...], cols,
            dimension_numbers=(((1,), (1,)), ((), ())),
            preferred_element_type=jnp.float32)

        # Rows are L2-normalized and 1/T is already folded in, so |s| <= 1/T:
        # use the fixed max m = 1/T (no online-max / rescale bookkeeping).
        on_diag = jnp.logical_and(col0 < row0 + tm, col0 + tn > row0)

        @pl.when(on_diag)
        def _():
            # Only blocks intersecting the global diagonal pay for the mask.
            row_g = lax.broadcasted_iota(jnp.int32, (tm, tn), 0) + row0
            col_g = lax.broadcasted_iota(jnp.int32, (tm, tn), 1) + col0
            sm = jnp.where(row_g == col_g, jnp.float32(mask_val), s)
            l_scr[...] += jnp.sum(jnp.exp(sm - inv_temp), axis=1, keepdims=True)

        @pl.when(jnp.logical_not(on_diag))
        def _():
            l_scr[...] += jnp.sum(jnp.exp(s - inv_temp), axis=1, keepdims=True)

    lse_ref[...] = jnp.float32(inv_temp) + jnp.log(l_scr[...])


def _pick_tile(total: int, cap: int, mult: int) -> int:
    """Largest multiple-of-`mult` divisor of `total` that is <= cap (else full)."""
    cap = min(cap, total)
    best = None
    t = mult
    while t <= cap:
        if total % t == 0:
            best = t
        t += mult
    # TODO(synk): pad 2N with masked rows when it has no friendly divisors.
    return best if best is not None else total


def ntxent_loss(z1, z2, temperature: float = 0.5, *, use_bf16: bool = True,
                col_tile_cap: int = 2048):
    assert z1.shape == z2.shape and z1.ndim == 2
    n, d = z1.shape
    assert n % 8 == 0, "batch size must be a multiple of 8"
    # TODO(synk): support batch sizes not divisible by 8 via row masking.
    two_n = 2 * n

    # Fixed-max softmax relies on |logit| <= 1/T; for very small T the
    # exp(-2/T) terms underflow f32.
    if temperature < 0.03:
        # TODO(synk): online-max fallback kernel for temperatures < 0.03.
        raise NotImplementedError("temperature < 0.03 is not supported")

    # Zero-pad features to a lane-width multiple (exact no-op for norms/dots).
    d_pad = max(128, ((d + 127) // 128) * 128)
    if d_pad != d:
        z1 = jnp.pad(z1, ((0, 0), (0, d_pad - d)))
        z2 = jnp.pad(z2, ((0, 0), (0, d_pad - d)))

    inv_temp = 1.0 / float(temperature)
    inv_sqrt_temp = float(temperature) ** -0.5
    mask_val = -1.0e9 * inv_temp           # diagonal mask after the 1/T fold
    rep_dtype = jnp.bfloat16 if use_bf16 else jnp.float32
    rep_itemsize = 2 if use_bf16 else 4

    # ---- pass 1: normalize + temperature fold + positive logits ----------
    tp = _pick_tile(n, 512, 8)
    rep2, pos2 = pl.pallas_call(
        functools.partial(_prep_kernel, inv_sqrt_temp=inv_sqrt_temp,
                          inv_temp=inv_temp),
        out_shape=(jax.ShapeDtypeStruct((2, n, d_pad), rep_dtype),
                   jax.ShapeDtypeStruct((2, n, 1), jnp.float32)),
        grid_spec=pltpu.PrefetchScalarGridSpec(
            num_scalar_prefetch=0,
            grid=(n // tp,),
            in_specs=[pl.BlockSpec((tp, d_pad), lambda i: (i, 0)),
                      pl.BlockSpec((tp, d_pad), lambda i: (i, 0))],
            out_specs=[pl.BlockSpec((2, tp, d_pad), lambda i: (0, i, 0)),
                       pl.BlockSpec((2, tp, 1), lambda i: (0, i, 0))]),
        compiler_params=pltpu.CompilerParams(
            dimension_semantics=("parallel",)),
    )(z1, z2)
    rep = rep2.reshape(two_n, d_pad)   # contiguous -> free reshape to (2N, D)
    pos = pos2.reshape(two_n, 1)

    # ---- pass 2: row-block grid, resident columns, fixed-max softmax -----
    # Row blocks: multiples of 16 (bf16 sublane packing), keep >= 4 blocks
    # when possible so v7x megacore gets work on both TensorCores.
    tm = _pick_tile(two_n, min(512, max(16, two_n // 4)), 16)
    tn = _pick_tile(two_n, col_tile_cap, 16)

    # Generation-aware VMEM budget: (possibly double-buffered) resident rep +
    # double-buffered row block + f32 logits/exp temporaries, clamped under
    # the chip's physical VMEM (64 MiB on v7x, 128 MiB on v5e/v6e).
    need = (2 * two_n * d_pad * rep_itemsize        # resident column operand
            + 2 * tm * d_pad * rep_itemsize         # double-buffered row block
            + 3 * tm * tn * 4                       # logits / exp temporaries
            + (2 << 20))                            # slack
    try:
        vmem_cap = int(pltpu.get_tpu_info().vmem_capacity_bytes)
    except Exception:  # pragma: no cover - fallback if the query is unavailable
        vmem_cap = 64 * 1024 * 1024
    vmem_limit = int(min(max(need, 32 * 1024 * 1024), 0.75 * vmem_cap))

    lse = pl.pallas_call(
        functools.partial(_flash_kernel, inv_temp=inv_temp, tn=tn,
                          mask_val=mask_val),
        out_shape=jax.ShapeDtypeStruct((two_n, 1), jnp.float32),
        grid_spec=pltpu.PrefetchScalarGridSpec(
            num_scalar_prefetch=0,
            grid=(two_n // tm,),
            in_specs=[
                pl.BlockSpec((tm, d_pad), lambda i: (i, 0)),
                # Full (2N, D) rep resident in VMEM; constant index_map means
                # it is fetched once and never re-DMA'd across row blocks.
                pl.BlockSpec((two_n, d_pad), lambda i: (0, 0)),
            ],
            out_specs=pl.BlockSpec((tm, 1), lambda i: (i, 0)),
            scratch_shapes=[pltpu.VMEM((tm, 1), jnp.float32)]),
        compiler_params=pltpu.CompilerParams(
            dimension_semantics=("parallel",),
            vmem_limit_bytes=vmem_limit),
    )(rep, rep)

    # CrossEntropyLoss default reduction: mean over the 2N rows.
    return jnp.mean(lse - pos)


def _reference_ntxent(z1, z2, temperature=0.5):
    """Pure-JAX reference reproducing the PyTorch module semantics."""
    def norm(z):
        return z / jnp.maximum(jnp.linalg.norm(z, axis=1, keepdims=True), 1e-12)

    z1 = norm(z1.astype(jnp.float32))
    z2 = norm(z2.astype(jnp.float32))
    n = z1.shape[0]
    rep = jnp.concatenate([z1, z2], axis=0)
    sim = jnp.matmul(rep, rep.T, precision=lax.Precision.HIGHEST)
    sim = jnp.where(jnp.eye(2 * n, dtype=bool), -1.0e9, sim) / temperature
    labels = jnp.concatenate([jnp.arange(n) + n, jnp.arange(n)])
    logp = jax.nn.log_softmax(sim, axis=1)
    return -jnp.mean(logp[jnp.arange(2 * n), labels])


if __name__ == "__main__":
    key = jax.random.PRNGKey(0)
    k1, k2, k3, k4 = jax.random.split(key, 4)

    # Small SimCLR projection-head shapes.
    N, D = 8, 32
    z1 = jax.random.normal(k1, (N, D), dtype=jnp.float32)
    z2 = jax.random.normal(k2, (N, D), dtype=jnp.float32)
    ref = _reference_ntxent(z1, z2, temperature=0.5)

    # Default fast path: bf16 MXU matmul (slightly looser tolerance vs f32 ref).
    loss = jax.block_until_ready(ntxent_loss(z1, z2, temperature=0.5))
    assert jnp.allclose(loss, ref, rtol=2e-2, atol=2e-2), (loss, ref)

    # f32 path sanity check.
    loss_f32 = jax.block_until_ready(
        ntxent_loss(z1, z2, temperature=0.5, use_bf16=False))
    assert jnp.allclose(loss_f32, ref, rtol=2e-2, atol=2e-2), (loss_f32, ref)

    # Slightly bigger case exercising multiple row blocks, multiple column
    # tiles (diag-gated and off-diagonal branches) and feature padding.
    N2, D2 = 32, 40
    w1 = jax.random.normal(k3, (N2, D2), dtype=jnp.float32)
    w2 = jax.random.normal(k4, (N2, D2), dtype=jnp.float32)
    ref2 = _reference_ntxent(w1, w2, temperature=0.2)
    loss2 = jax.block_until_ready(
        ntxent_loss(w1, w2, temperature=0.2, col_tile_cap=16))
    assert jnp.allclose(loss2, ref2, rtol=2e-2, atol=2e-2), (loss2, ref2)

    print("KERNEL_OK")
</pallas_src>

<mosaic_0001>
module attributes {stable_mosaic.version = 11 : i64} {
  func.func @_prep_kernel(%arg0: i32, %arg1: memref<8x128xf32, #tpu.memory_space<vmem>>, %arg2: memref<8x128xf32, #tpu.memory_space<vmem>>, %arg3: memref<2x8x128xbf16, #tpu.memory_space<vmem>>, %arg4: memref<2x8x1xf32, #tpu.memory_space<vmem>>) attributes {dimension_semantics = [#tpu.dimension_semantics<parallel>], iteration_bounds = array<i64: 1>, scalar_prefetch = 0 : i64, scratch_operands = 0 : i64, tpu.core_type = #tpu.core_type<tc>, window_params = [{transform_indices = @transform_0, window_bounds = array<i64: 8, 128>}, {transform_indices = @transform_1, window_bounds = array<i64: 8, 128>}, {transform_indices = @transform_2, window_bounds = array<i64: 2, 8, 128>}, {transform_indices = @transform_3, window_bounds = array<i64: 2, 8, 1>}]} {
    %c0 = arith.constant 0 : index
    %c0_0 = arith.constant 0 : index
    %0 = vector.load %arg1[%c0, %c0_0] : memref<8x128xf32, #tpu.memory_space<vmem>>, vector<8x128xf32>
    %c0_1 = arith.constant 0 : index
    %c0_2 = arith.constant 0 : index
    %1 = vector.load %arg2[%c0_1, %c0_2] : memref<8x128xf32, #tpu.memory_space<vmem>>, vector<8x128xf32>
    %2 = arith.mulf %0, %0 : vector<8x128xf32>
    %cst = arith.constant dense<0.000000e+00> : vector<8xf32>
    %3 = vector.multi_reduction <add>, %2, %cst [1] : vector<8x128xf32> to vector<8xf32>
    %4 = vector.shape_cast %3 : vector<8xf32> to vector<8x1xf32>
    %cst_3 = arith.constant 1.000000e-24 : f32
    %5 = vector.broadcast %cst_3 : f32 to vector<8x1xf32>
    %6 = arith.maximumf %4, %5 : vector<8x1xf32>
    %7 = math.rsqrt %6 : vector<8x1xf32>
    %8 = arith.mulf %1, %1 : vector<8x128xf32>
    %cst_4 = arith.constant dense<0.000000e+00> : vector<8xf32>
    %9 = vector.multi_reduction <add>, %8, %cst_4 [1] : vector<8x128xf32> to vector<8xf32>
    %10 = vector.shape_cast %9 : vector<8xf32> to vector<8x1xf32>
    %cst_5 = arith.constant 1.000000e-24 : f32
    %11 = vector.broadcast %cst_5 : f32 to vector<8x1xf32>
    %12 = arith.maximumf %10, %11 : vector<8x1xf32>
    %13 = math.rsqrt %12 : vector<8x1xf32>
    %14 = vector.broadcast %7 : vector<8x1xf32> to vector<8x128xf32>
    %15 = arith.mulf %0, %14 : vector<8x128xf32>
    %16 = vector.broadcast %13 : vector<8x1xf32> to vector<8x128xf32>
    %17 = arith.mulf %1, %16 : vector<8x128xf32>
    %18 = arith.mulf %15, %17 : vector<8x128xf32>
    %cst_6 = arith.constant dense<0.000000e+00> : vector<8xf32>
    %19 = vector.multi_reduction <add>, %18, %cst_6 [1] : vector<8x128xf32> to vector<8xf32>
    %20 = vector.shape_cast %19 : vector<8xf32> to vector<8x1xf32>
    %cst_7 = arith.constant 2.000000e+00 : f32
    %21 = vector.broadcast %cst_7 : f32 to vector<8x1xf32>
    %22 = arith.mulf %20, %21 : vector<8x1xf32>
    %c0_8 = arith.constant 0 : index
    %c0_9 = arith.constant 0 : index
    %c0_10 = arith.constant 0 : index
    %23 = vector.load %arg4[%c0_8, %c0_9, %c0_10] : memref<2x8x1xf32, #tpu.memory_space<vmem>>, vector<1x8x1xf32>
    %24 = vector.shape_cast %23 : vector<1x8x1xf32> to vector<8x1xf32>
    %25 = vector.shape_cast %22 : vector<8x1xf32> to vector<1x8x1xf32>
    tpu.vector_store %arg4[%c0_8, %c0_9, %c0_10], %25 {strides = array<i32>} : memref<2x8x1xf32, #tpu.memory_space<vmem>>, vector<1x8x1xf32>,
    %c1 = arith.constant 1 : index
    %c0_11 = arith.constant 0 : index
    %c0_12 = arith.constant 0 : index
    %26 = vector.load %arg4[%c1, %c0_11, %c0_12] : memref<2x8x1xf32, #tpu.memory_space<vmem>>, vector<1x8x1xf32>
    %27 = vector.shape_cast %26 : vector<1x8x1xf32> to vector<8x1xf32>
    %28 = vector.shape_cast %22 : vector<8x1xf32> to vector<1x8x1xf32>
    tpu.vector_store %arg4[%c1, %c0_11, %c0_12], %28 {strides = array<i32>} : memref<2x8x1xf32, #tpu.memory_space<vmem>>, vector<1x8x1xf32>,
    %cst_13 = arith.constant 1.41421354 : f32
    %29 = vector.broadcast %cst_13 : f32 to vector<8x128xf32>
    %30 = arith.mulf %15, %29 : vector<8x128xf32>
    %31 = arith.truncf %30 : vector<8x128xf32> to vector<8x128xbf16>
    %c0_14 = arith.constant 0 : index
    %c0_15 = arith.constant 0 : index
    %c0_16 = arith.constant 0 : index
    %32 = vector.load %arg3[%c0_14, %c0_15, %c0_16] : memref<2x8x128xbf16, #tpu.memory_space<vmem>>, vector<1x8x128xbf16>
    %33 = vector.shape_cast %32 : vector<1x8x128xbf16> to vector<8x128xbf16>
    %34 = vector.shape_cast %31 : vector<8x128xbf16> to vector<1x8x128xbf16>
    tpu.vector_store %arg3[%c0_14, %c0_15, %c0_16], %34 {strides = array<i32>} : memref<2x8x128xbf16, #tpu.memory_space<vmem>>, vector<1x8x128xbf16>,
    %cst_17 = arith.constant 1.41421354 : f32
    %35 = vector.broadcast %cst_17 : f32 to vector<8x128xf32>
    %36 = arith.mulf %17, %35 : vector<8x128xf32>
    %37 = arith.truncf %36 : vector<8x128xf32> to vector<8x128xbf16>
    %c1_18 = arith.constant 1 : index
    %c0_19 = arith.constant 0 : index
    %c0_20 = arith.constant 0 : index
    %38 = vector.load %arg3[%c1_18, %c0_19, %c0_20] : memref<2x8x128xbf16, #tpu.memory_space<vmem>>, vector<1x8x128xbf16>
    %39 = vector.shape_cast %38 : vector<1x8x128xbf16> to vector<8x128xbf16>
    %40 = vector.shape_cast %37 : vector<8x128xbf16> to vector<1x8x128xbf16>
    tpu.vector_store %arg3[%c1_18, %c0_19, %c0_20], %40 {strides = array<i32>} : memref<2x8x128xbf16, #tpu.memory_space<vmem>>, vector<1x8x128xbf16>,
    return
  }
  func.func @transform_0(%arg0: i32) -> (i32, i32) {
    %c0_i32 = arith.constant 0 : i32
    %c0_i32_0 = arith.constant 0 : i32
    return %arg0, %c0_i32 : i32, i32
  }
  func.func @transform_1(%arg0: i32) -> (i32, i32) {
    %c0_i32 = arith.constant 0 : i32
    %c0_i32_0 = arith.constant 0 : i32
    return %arg0, %c0_i32 : i32, i32
  }
  func.func @transform_2(%arg0: i32) -> (i32, i32, i32) {
    %c0_i32 = arith.constant 0 : i32
    %c0_i32_0 = arith.constant 0 : i32
    %c0_i32_1 = arith.constant 0 : i32
    return %c0_i32, %arg0, %c0_i32_0 : i32, i32, i32
  }
  func.func @transform_3(%arg0: i32) -> (i32, i32, i32) {
    %c0_i32 = arith.constant 0 : i32
    %c0_i32_0 = arith.constant 0 : i32
    %c0_i32_1 = arith.constant 0 : i32
    return %c0_i32, %arg0, %c0_i32_0 : i32, i32, i32
  }
}

</mosaic_0001>

<bundles_post_ra>
// kernel: tpu_custom_call.1
= control target key start
LH: loop header
LB: loop body
LE: loop exit
PB: predicated region body
PF: predicated region fallthrough
CT: control target
= control target key end

     0   :  { %9 = vsyncpa [#allocation3], 0  ;;  %s243_s0 = inlined_call_operand.hbm [shape: f32[8,128], index: 0, kind: input, shape index: {}]   ;;  %s244_s1 = inlined_call_operand.hbm [shape: f32[8,128], index: 1, kind: input, shape index: {}]   ;;  %s245_s2 = inlined_call_operand.hbm [shape: bf16[2,8,128], index: 2, kind: output, shape index: {0}]   ;;  %s246_s3 = inlined_call_operand.vmem [shape: f32[2,8,1], index: 3, kind: output, shape index: {1}]  }
   0x1   :  { %10 = vsyncpa [#allocation6], 0 }
   0x2   :  { %11 = vsyncpa [#allocation4], 0  ;;  %s176_s12 = smov [#allocation2]   ;;  %s177_s14 = smov [#allocation5]  }
   0x3   :  { %s18_s13 = sshll.u32 %s176_s12, 4  ;;  %s28_s15 = sshll.u32 %s177_s14, 4  ;;  %s19_s13 = int_to_ptr.vmem [resolvable:$true] %s18_s13  ;;  %s29_s15 = int_to_ptr.vmem [resolvable:$true] %s28_s15 }
   0x4   :  { %s104_s18 = scalar_lea.hbm %s243_s0, 128 }
   0x5   :  { %p105_p0 = scmp.ne.s32.totalorder %s243_s0, %s104_s18  ;;  %p108_p1 = scmp.lt.u32.totalorder %s104_s18, %s243_s0 }
   0x7   :  { %p110_p2 = pnand %p108_p1, %p105_p0 }
   0x9   :  { %113 = shalt.err (!%p110_p2)
}
   0xa   :  { %s114_s23 = scalar_lea.vmem %s19_s13, 128  ;;  %p119_p4 = scmp.lt.s32.totalorder %s19_s13, %s19_s13 }
   0xb   :  { %p115_p3 = scmp.ne.s32.totalorder %s19_s13, %s114_s23  ;;  %p120_p5 = scmp.lt.s32.totalorder %s114_s23, %s114_s23 }
   0xd   :  { %p121_p6 = por %p120_p5, %p119_p4 }
   0xf   :  { %p122_p7 = pnand %p121_p6, %p115_p3 }
  0x11   :  { %125 = shalt.err (!%p122_p7)
}
  0x12   :  { %21 = dma.hbm_to_vmem [thread:$0]  %s243_s0, 128, %s19_s13, [#allocation3]  }
  0x13   :  { %s126_s28 = scalar_lea.hbm %s244_s1, 128 }
  0x14   :  { %p127_p8 = scmp.ne.s32.totalorder %s244_s1, %s126_s28  ;;  %p130_p9 = scmp.lt.u32.totalorder %s126_s28, %s244_s1 }
  0x16   :  { %p132_p10 = pnand %p130_p9, %p127_p8 }
  0x18   :  { %135 = shalt.err (!%p132_p10)
}
  0x19   :  { %s136_s6 = scalar_lea.vmem %s29_s15, 128  ;;  %p141_p12 = scmp.lt.s32.totalorder %s29_s15, %s29_s15 }
  0x1a   :  { %p137_p11 = scmp.ne.s32.totalorder %s29_s15, %s136_s6  ;;  %p142_p13 = scmp.lt.s32.totalorder %s136_s6, %s136_s6 }
  0x1c   :  { %p143_p0 = por %p142_p13, %p141_p12 }
  0x1e   :  { %p144_p1 = pnand %p143_p0, %p137_p11 }
  0x20   :  { %147 = shalt.err (!%p144_p1)
}
  0x21   :  { %31 = dma.hbm_to_vmem [thread:$0]  %s244_s1, 128, %s29_s15, [#allocation6]  }
  0x22   :  { %170 = dma.done.wait [#allocation3], 128  }
  0x23   :  { %171 = vsyncadd [#allocation3], 4294967168 }
  0x24   :  { %172 = dma.done.wait [#allocation6], 128  }
  0x25   :  { %173 = vsyncadd [#allocation6], 4294967168  ;;  %v38_v0 = vld [vmem:[#allocation2] sm:$0xff]  ;;  %v39_v1 = vld [vmem:[#allocation5] sm:$0xff]  ;;  %s178_s1 = smov [#allocation7]  }
  0x26   :  { %v40_v2 = vmul.f32 %v38_v0, %v38_v0  ;;  %v45_v3 = vmul.f32 %v39_v1, %v39_v1  ;;  %s72_s8 = sshll.u32 %s178_s1, 4  ;;  %s73_s8 = int_to_ptr.vmem [resolvable:$true] %s72_s8 }
  0x27   :  { %s148_s9 = scalar_lea.vmem %s73_s8, 128  ;;  %p153_p3 = scmp.lt.s32.totalorder %s73_s8, %s73_s8 }
  0x28   :  { %41 = vadd.xlane.f32.xlu0 %v40_v2  ;;  %p149_p2 = scmp.ne.s32.totalorder %s73_s8, %s148_s9  ;;  %p154_p4 = scmp.lt.s32.totalorder %s148_s9, %s148_s9 }
  0x2a   :  { %p155_p5 = por %p154_p4, %p153_p3 }
  0x2c   :  { %46 = vadd.xlane.f32.xlu0 %v45_v3  ;;  %p156_p6 = pnand %p155_p5, %p149_p2 }
  0xb5   :  { %v42_v4 = vpop.xlane.xlu0 %41 }
  0xb6   :  { %v43_v5 = vmax.f32 %v42_v4, 1e-24 }
  0xb8   :  { %100 = vrsqrt.f32 %v43_v5 }
  0xb9   :  { %v47_v6 = vpop.xlane.xlu0 %46 }
  0xba   :  { %v48_v7 = vmax.f32 %v47_v6, 1e-24 }
  0xbc   :  { %102 = vrsqrt.f32 %v48_v7 }
  0xc2   :  { %v101_v8 = vpop.eup %100 }
  0xc3   :  { %v50_v9 = vmul.f32 %v101_v8, %v38_v0 }
  0xc5   :  { %v60_v13 = vmul.f32 1.4142135, %v50_v9 }
  0xc6   :  { %v103_v10 = vpop.eup %102 }
  0xc7   :  { %v51_v11 = vmul.f32 %v103_v10, %v39_v1 }
  0xc9   :  { %v52_v12 = vmul.f32 %v51_v11, %v50_v9  ;;  %v63_v14 = vmul.f32 1.4142135, %v51_v11 }
  0xcb   :  { %v93_v15 = vpack.c.bf16 %v63_v14, %v60_v13  ;;  %53 = vadd.xlane.f32.xlu1 %v52_v12 }
  0xcd   :  { %94 = vst [vmem:[#allocation7] sm:$0xff] %v93_v15  }
  0xce   :  { %159 = shalt.err (!%p156_p6)
}
  0xcf   :  { %s160_s12 = scalar_lea.hbm %s245_s2, 128 }
  0xd0   :  { %p161_p7 = scmp.ne.s32.totalorder %s245_s2, %s160_s12  ;;  %p164_p8 = scmp.lt.u32.totalorder %s160_s12, %s245_s2 }
  0xd2   :  { %p166_p9 = pnand %p164_p8, %p161_p7 }
  0xd4   :  { %169 = shalt.err (!%p166_p9)
}
  0xd5   :  { %s179_s17 = smov 64   ;;  %s180_s18 = smov 4   ;;  %vm56_vm0 = vcmask 7168  }
  0xd6   :  { %78 = dma.vmem_to_hbm [thread:$0]  %s73_s8, 128, %s245_s2, [#allocation4], %s179_s17, %s179_s17, %s180_s18  }
 0x158   :  { %v54_v16 = vpop.xlane.xlu1 %53 }
 0x159   :  { %v55_v17 = vmul.f32 2.0, %v54_v16 }
 0x15b   :  { %57 = vst.msk [vmem:[%s246_s3] sm:$0xff] %vm56_vm0, %v55_v17  ;;  %89 = vst.msk [vmem:[%s246_s3 + $0x8] sm:$0xff] %vm56_vm0, %v55_v17 }
 0x15c   :  { %174 = dma.done.wait [#allocation4], 128  }
 0x15d   :  { %175 = vsyncadd [#allocation4], 4294967168 }
 0x15e   :  { %86 = vsyncpa [#allocation3], 1 }
 0x15f   :  { %87 = vsyncpa [#allocation6], 1 }
 0x160   :  { %88 = vsyncpa [#allocation4], 1 }

</bundles_post_ra>
